<compile_context>
chip_gen: v6e
topology: v6e:2x2x1
jax: 0.10.0
libtpu: 0.0.40
codegen_flags: <defaults>
</compile_context>

<pallas_src>
import math
import functools

import jax
import jax.numpy as jnp
from jax.experimental import pallas as pl
from jax.experimental.pallas import tpu as pltpu


def make_positional_encoding_table(d_model: int, max_len: int = 5000,
                                   dtype=jnp.float32) -> jnp.ndarray:
    """Deterministic pe buffer, identical to the PyTorch __init__."""
    position = jnp.arange(max_len, dtype=jnp.float32)[:, None]               # (max_len, 1)
    div_term = jnp.exp(
        jnp.arange(0, d_model, 2, dtype=jnp.float32) * (-math.log(10000.0) / d_model)
    )                                                                         # (d_model//2,)
    pe = jnp.zeros((max_len, 1, d_model), dtype=jnp.float32)
    pe = pe.at[:, 0, 0::2].set(jnp.sin(position * div_term))
    pe = pe.at[:, 0, 1::2].set(jnp.cos(position * div_term))
    return pe.astype(dtype)


def _mix32(x):
    """SplitMix32-style avalanche mixer (all uint32 ops, VPU-friendly)."""
    x = x ^ (x >> 16)
    x = x * jnp.uint32(0x7FEB352D)
    x = x ^ (x >> 15)
    x = x * jnp.uint32(0x846CA68B)
    x = x ^ (x >> 16)
    return x


def _pe_dropout_kernel(seed_ref, x_ref, pe_ref, o_ref, *,
                       p: float, apply_dropout: bool, block_rows: int):
    # x_ref: (ts, B, D), pe_ref: (ts, 1, D) -> broadcast add over batch axis.
    y = x_ref[...] + pe_ref[...]
    if apply_dropout:
        ts, B, D = y.shape
        # Global per-element counter (unique across the whole array & grid).
        r = jax.lax.broadcasted_iota(jnp.int32, (ts, B, D), 0).astype(jnp.uint32)
        b = jax.lax.broadcasted_iota(jnp.int32, (ts, B, D), 1).astype(jnp.uint32)
        d = jax.lax.broadcasted_iota(jnp.int32, (ts, B, D), 2).astype(jnp.uint32)
        row0 = (pl.program_id(0) * block_rows).astype(jnp.uint32)
        idx = ((r + row0) * jnp.uint32(B) + b) * jnp.uint32(D) + d
        # Stateless counter-based bits: hash(seed) xor'd into per-element index.
        seed_h = _mix32(seed_ref[0].astype(jnp.uint32) ^ jnp.uint32(0x9E3779B9))
        bits = _mix32(idx ^ seed_h)
        # Inverted dropout: keep with prob (1-p), scale kept values by 1/(1-p).
        threshold = jnp.uint32(min(int(p * 2.0**32), 2**32 - 1))
        keep = bits >= threshold
        scale = 1.0 / (1.0 - p)   # python float -> weak type, preserves y dtype
        y = jnp.where(keep, y * scale, jnp.zeros_like(y))
    o_ref[...] = y.astype(o_ref.dtype)


def positional_encoding_forward(
    x: jnp.ndarray,
    pe: jnp.ndarray,
    *,
    dropout_p: float = 0.1,
    training: bool = False,
    seed: int = 0,
    target_block_bytes: int = 2 * 1024 * 1024,
) -> jnp.ndarray:
    """x: (S, B, D); pe: (max_len, 1, D).  Returns dropout(x + pe[:S])."""
    S, B, D = x.shape

    # Same first-dim extent as x -> identical partial-block handling at the tail.
    pe_slice = pe[:S].astype(x.dtype)

    apply_dropout = bool(training) and dropout_p > 0.0
    if apply_dropout and dropout_p >= 1.0:
        return jnp.zeros_like(x)

    itemsize = jnp.dtype(x.dtype).itemsize
    bytes_per_row = B * D * itemsize
    # Tile the sequence axis so each x block is ~target_block_bytes (mem-bound:
    # big tiles amortize the ~0.35 us per-grid-step overhead).
    ts = int(max(1, min(S, target_block_bytes // max(1, bytes_per_row))))
    grid = (pl.cdiv(S, ts),)

    # Double-buffered (x + out + pe) blocks, with 2x margin; clamp to 32 MiB so
    # it is safe on v7x (64 MiB physical) while covering v5e's 16 MiB default.
    vmem_needed = 2 * (2 * ts * B * D + ts * D) * itemsize
    vmem_limit = int(min(max(2 * vmem_needed, 16 * 1024 * 1024), 32 * 1024 * 1024))

    seed_arr = jnp.asarray([seed], dtype=jnp.int32)
    kernel = functools.partial(
        _pe_dropout_kernel,
        p=float(dropout_p),
        apply_dropout=apply_dropout,
        block_rows=ts,
    )

    return pl.pallas_call(
        kernel,
        out_shape=jax.ShapeDtypeStruct((S, B, D), x.dtype),
        grid_spec=pltpu.PrefetchScalarGridSpec(
            num_scalar_prefetch=1,          # seed -> SMEM
            grid=grid,
            in_specs=[
                pl.BlockSpec((ts, B, D), lambda i, seed: (i, 0, 0)),
                pl.BlockSpec((ts, 1, D), lambda i, seed: (i, 0, 0)),
            ],
            out_specs=pl.BlockSpec((ts, B, D), lambda i, seed: (i, 0, 0)),
        ),
        compiler_params=pltpu.CompilerParams(
            # Stateless per-element RNG -> grid steps independent -> shardable
            # across the two TensorCores on v7x (no-op on v5e/v6e).
            dimension_semantics=("parallel",),
            vmem_limit_bytes=vmem_limit,
        ),
    )(seed_arr, x, pe_slice)


if __name__ == "__main__":
    # Small shapes consistent with the module: seq=8, batch=2, d_model=32.
    S, B, D = 8, 2, 32
    key = jax.random.PRNGKey(0)
    x = jax.random.normal(key, (S, B, D), dtype=jnp.float32)

    pe = make_positional_encoding_table(d_model=D, max_len=5000)

    # Eval mode (dropout = identity): verify against the pure-JAX reference.
    out_eval = positional_encoding_forward(x, pe, dropout_p=0.1, training=False)
    out_eval = jax.block_until_ready(out_eval)
    ref = x + pe[:S]
    assert jnp.allclose(out_eval, ref, atol=1e-6), "eval-mode mismatch vs reference"

    # Training mode: exercise the in-kernel dropout path.  Every element must be
    # either 0 (dropped) or the eval value scaled by 1/(1-p) (kept).
    p = 0.1
    out_train = positional_encoding_forward(x, pe, dropout_p=p, training=True, seed=123)
    out_train = jax.block_until_ready(out_train)
    scaled = ref / (1.0 - p)
    consistent = jnp.all(
        jnp.isclose(out_train, 0.0, atol=1e-6) | jnp.isclose(out_train, scaled, atol=1e-5)
    )
    assert bool(consistent), "training-mode dropout values inconsistent"

    print("KERNEL_OK")
</pallas_src>

<mosaic_0001>
module attributes {stable_mosaic.version = 11 : i64} {
  func.func @_pe_dropout_kernel(%arg0: i32, %arg1: memref<1xi32, #tpu.memory_space<smem>>, %arg2: memref<8x2x32xf32, #tpu.memory_space<vmem>>, %arg3: memref<8x1x32xf32, #tpu.memory_space<vmem>>, %arg4: memref<8x2x32xf32, #tpu.memory_space<vmem>>) attributes {dimension_semantics = [#tpu.dimension_semantics<parallel>], iteration_bounds = array<i64: 1>, scalar_prefetch = 1 : i64, scratch_operands = 0 : i64, tpu.core_type = #tpu.core_type<tc>, window_params = [{transform_indices = @transform_0, window_bounds = array<i64: 8, 2, 32>}, {transform_indices = @transform_1, window_bounds = array<i64: 8, 1, 32>}, {transform_indices = @transform_2, window_bounds = array<i64: 8, 2, 32>}]} {
    %c0 = arith.constant 0 : index
    %c0_0 = arith.constant 0 : index
    %c0_1 = arith.constant 0 : index
    %0 = vector.load %arg2[%c0, %c0_0, %c0_1] : memref<8x2x32xf32, #tpu.memory_space<vmem>>, vector<8x2x32xf32>
    %c0_2 = arith.constant 0 : index
    %c0_3 = arith.constant 0 : index
    %c0_4 = arith.constant 0 : index
    %1 = vector.load %arg3[%c0_2, %c0_3, %c0_4] : memref<8x1x32xf32, #tpu.memory_space<vmem>>, vector<8x1x32xf32>
    %2 = vector.broadcast %1 : vector<8x1x32xf32> to vector<8x2x32xf32>
    %3 = arith.addf %0, %2 : vector<8x2x32xf32>
    %c0_5 = arith.constant 0 : index
    %c0_6 = arith.constant 0 : index
    %c0_7 = arith.constant 0 : index
    %4 = vector.load %arg4[%c0_5, %c0_6, %c0_7] : memref<8x2x32xf32, #tpu.memory_space<vmem>>, vector<8x2x32xf32>
    tpu.vector_store %arg4[%c0_5, %c0_6, %c0_7], %3 {strides = array<i32>} : memref<8x2x32xf32, #tpu.memory_space<vmem>>, vector<8x2x32xf32>,
    return
  }
  func.func @transform_0(%arg0: i32, %arg1: memref<1xi32, #tpu.memory_space<smem>>) -> (i32, i32, i32) {
    %c0_i32 = arith.constant 0 : i32
    %c0_i32_0 = arith.constant 0 : i32
    %c0_i32_1 = arith.constant 0 : i32
    return %arg0, %c0_i32, %c0_i32_0 : i32, i32, i32
  }
  func.func @transform_1(%arg0: i32, %arg1: memref<1xi32, #tpu.memory_space<smem>>) -> (i32, i32, i32) {
    %c0_i32 = arith.constant 0 : i32
    %c0_i32_0 = arith.constant 0 : i32
    %c0_i32_1 = arith.constant 0 : i32
    return %arg0, %c0_i32, %c0_i32_0 : i32, i32, i32
  }
  func.func @transform_2(%arg0: i32, %arg1: memref<1xi32, #tpu.memory_space<smem>>) -> (i32, i32, i32) {
    %c0_i32 = arith.constant 0 : i32
    %c0_i32_0 = arith.constant 0 : i32
    %c0_i32_1 = arith.constant 0 : i32
    return %arg0, %c0_i32, %c0_i32_0 : i32, i32, i32
  }
}

</mosaic_0001>

<bundles_post_ra>
// kernel: tpu_custom_call.1
= control target key start
LH: loop header
LB: loop body
LE: loop exit
PB: predicated region body
PF: predicated region fallthrough
CT: control target
= control target key end

     0   :  { %9 = vsyncpa [#allocation5], 0  ;;  %s275_s0 = inlined_call_operand.<no memory space> [shape: s32[1], index: 0, kind: input, shape index: {}]   ;;  %s276_s1 = inlined_call_operand.hbm [shape: f32[8,2,32], index: 1, kind: input, shape index: {}]   ;;  %s277_s2 = inlined_call_operand.hbm [shape: f32[8,1,32], index: 2, kind: input, shape index: {}]   ;;  %s278_s3 = inlined_call_operand.hbm [shape: f32[8,2,32], index: 3, kind: output, shape index: {}]  }
   0x1   :  { %10 = vsyncpa [#allocation8], 0 }
   0x2   :  { %11 = vsyncpa [#allocation6], 0  ;;  %s222_s12 = smov [#allocation4]  }
   0x3   :  { %s17_s13 = sshll.u32 %s222_s12, 4  ;;  %s18_s13 = int_to_ptr.vmem [resolvable:$true] %s17_s13 }
   0x4   :  { %s164_s14 = scalar_lea.vmem %s18_s13, 256  ;;  %p169_p1 = scmp.lt.s32.totalorder %s18_s13, %s18_s13 }
   0x5   :  { %p165_p0 = scmp.ne.s32.totalorder %s18_s13, %s164_s14  ;;  %p170_p2 = scmp.lt.s32.totalorder %s164_s14, %s164_s14 }
   0x7   :  { %p171_p3 = por %p170_p2, %p169_p1 }
   0x9   :  { %p172_p4 = pnand %p171_p3, %p165_p0 }
   0xb   :  { %175 = shalt.err (!%p172_p4)
}
   0xc   :  { %s223_s0 = smov 32   ;;  %s224_s15 = smov 2  }
   0xd   :  { %23 = dma.hbm_to_vmem [thread:$0]  %s276_s1, 256, %s18_s13, [#allocation5], %s223_s0, %s223_s0, %s224_s15  }
   0xe   :  { %s225_s18 = smov [#allocation7]  }
   0xf   :  { %s29_s19 = sshll.u32 %s225_s18, 4  ;;  %s30_s19 = int_to_ptr.vmem [resolvable:$true] %s29_s19 }
  0x10   :  { %s184_s20 = scalar_lea.vmem %s30_s19, 128  ;;  %p189_p6 = scmp.lt.s32.totalorder %s30_s19, %s30_s19 }
  0x11   :  { %p185_p5 = scmp.ne.s32.totalorder %s30_s19, %s184_s20  ;;  %p190_p7 = scmp.lt.s32.totalorder %s184_s20, %s184_s20 }
  0x13   :  { %p191_p8 = por %p190_p7, %p189_p6 }
  0x15   :  { %p192_p9 = pnand %p191_p8, %p185_p5 }
  0x17   :  { %195 = shalt.err (!%p192_p9)
}
  0x18   :  { %s226_s21 = smov 16   ;;  %s227_s22 = smov 1  }
  0x19   :  { %35 = dma.hbm_to_vmem [thread:$0]  %s277_s2, 128, %s30_s19, [#allocation8], %s226_s21, %s226_s21, %s227_s22  }
  0x1a   :  { %216 = dma.done.wait [#allocation5], 256  }
  0x1b   :  { %217 = vsyncadd [#allocation5], 4294967040 }
  0x1c   :  { %218 = dma.done.wait [#allocation8], 128  }
  0x1d   :  { %219 = vsyncadd [#allocation8], 4294967168  ;;  %vm114_vm0 = vcmask 254976   ;;  %s228_s1 = smov [#allocation9]   ;;  %v42_v0 = vld [vmem:[#allocation4] sm:$0x3] }
  0x1e   :  { %s258_s25 = sshll.u32 %s228_s1, 4  ;;  %v141_v1 = vld [vmem:[#allocation7] ss:$0 sm:$0xff]  ;;  %v43_v2 = vld [vmem:[#allocation4 + $0x2] sm:$0x3]  ;;  %s129_s25 = int_to_ptr.vmem [resolvable:$true] %s258_s25 }
  0x1f   :  { %v106_v3 = vadd.f32 %v141_v1, %v42_v0  ;;  %v142_v4 = vld [vmem:[#allocation7 + $0x1] ss:$0 sm:$0xff]  ;;  %v44_v5 = vld [vmem:[#allocation4 + $0x4] sm:$0x3]  ;;  %v143_v6 = vld [vmem:[#allocation7 + $0x2] ss:$0 sm:$0xff]  ;;  %p201_p11 = scmp.lt.s32.totalorder %s129_s25, %s129_s25 }
  0x20   :  { %v107_v7 = vadd.f32 %v142_v4, %v43_v2  ;;  %v108_v8 = vadd.f32 %v143_v6, %v44_v5  ;;  %v45_v9 = vld [vmem:[#allocation4 + $0x6] sm:$0x3]  ;;  %v144_v10 = vld [vmem:[#allocation7 + $0x3] ss:$0 sm:$0xff]  ;;  %v46_v11 = vld [vmem:[#allocation4 + $0x8] sm:$0x3] }
  0x21   :  { %115 = vst.msk [vmem:[#allocation9] sm:$0x3] %vm114_vm0, %v106_v3  ;;  %v109_v12 = vadd.f32 %v144_v10, %v45_v9  ;;  %v145_v13 = vld [vmem:[#allocation7 + $0x4] ss:$0 sm:$0xff]  ;;  %v47_v14 = vld [vmem:[#allocation4 + $0xa] sm:$0x3] }
  0x22   :  { %v146_v15 = vld [vmem:[#allocation7 + $0x5] ss:$0 sm:$0xff]  ;;  %116 = vst.msk [vmem:[#allocation9 + $0x2] sm:$0x3] %vm114_vm0, %v107_v7  ;;  %117 = vst.msk [vmem:[#allocation9 + $0x4] sm:$0x3] %vm114_vm0, %v108_v8  ;;  %v110_v16 = vadd.f32 %v145_v13, %v46_v11 }
  0x23   :  { %v111_v17 = vadd.f32 %v146_v15, %v47_v14  ;;  %v48_v18 = vld [vmem:[#allocation4 + $0xc] sm:$0x3]  ;;  %v147_v19 = vld [vmem:[#allocation7 + $0x6] ss:$0 sm:$0xff]  ;;  %v49_v20 = vld [vmem:[#allocation4 + $0xe] sm:$0x3] }
  0x24   :  { %118 = vst.msk [vmem:[#allocation9 + $0x6] sm:$0x3] %vm114_vm0, %v109_v12  ;;  %v112_v21 = vadd.f32 %v147_v19, %v48_v18  ;;  %v148_v22 = vld [vmem:[#allocation7 + $0x7] ss:$0 sm:$0xff]  ;;  %119 = vst.msk [vmem:[#allocation9 + $0x8] sm:$0x3] %vm114_vm0, %v110_v16 }
  0x25   :  { %120 = vst.msk [vmem:[#allocation9 + $0xa] sm:$0x3] %vm114_vm0, %v111_v17  ;;  %v113_v23 = vadd.f32 %v148_v22, %v49_v20  ;;  %s196_s2 = scalar_lea.vmem %s129_s25, 256 }
  0x26   :  { %121 = vst.msk [vmem:[#allocation9 + $0xc] sm:$0x3] %vm114_vm0, %v112_v21  ;;  %p197_p10 = scmp.ne.s32.totalorder %s129_s25, %s196_s2  ;;  %p202_p12 = scmp.lt.s32.totalorder %s196_s2, %s196_s2 }
  0x27   :  { %122 = vst.msk [vmem:[#allocation9 + $0xe] sm:$0x3] %vm114_vm0, %v113_v23 }
  0x28   :  { %p203_p13 = por %p202_p12, %p201_p11 }
  0x2a   :  { %p204_p0 = pnand %p203_p13, %p197_p10 }
  0x2c   :  { %207 = shalt.err (!%p204_p0)
}
  0x2d   :  { %134 = dma.vmem_to_hbm [thread:$0]  %s129_s25, 256, %s278_s3, [#allocation6], %s223_s0, %s223_s0, %s224_s15  }
  0x2e   :  { %220 = dma.done.wait [#allocation6], 256  }
  0x2f   :  { %221 = vsyncadd [#allocation6], 4294967040 }
  0x30   :  { %138 = vsyncpa [#allocation5], 1 }
  0x31   :  { %139 = vsyncpa [#allocation8], 1 }
  0x32   :  { %140 = vsyncpa [#allocation6], 1 }

</bundles_post_ra>
